<compile_context>
chip_gen: v7x
topology: tpu7x:2x2x1
jax: 0.10.0
libtpu: 0.0.40
codegen_flags: <defaults>
</compile_context>

<pallas_src>
import functools
import math

import jax
import jax.numpy as jnp
from jax import lax
from jax.experimental import pallas as pl
from jax.experimental.pallas import tpu as pltpu


_MASK_VALUE = -1e30  # large finite negative; exp() underflows to exactly 0


# ---------------------------------------------------------------------------
# Kernel 1: fused QKV projection -> head-major (B, H, T, D) q, k, v.
# One wide matmul per (batch, row-tile) step; weight block index is constant
# so the (C, 3C) weight slab stays resident in VMEM.
# ---------------------------------------------------------------------------
def _qkv_proj_kernel(x_ref, w_ref, b_ref, q_ref, k_ref, v_ref, *,
                     n_head, head_dim):
    H, D = n_head, head_dim
    C = H * D
    x = x_ref[...]                                            # (t, C)
    qkv = jnp.dot(x, w_ref[...], preferred_element_type=jnp.float32)
    qkv = (qkv + b_ref[...]).astype(q_ref.dtype)              # (t, 3C)
    # Head split: columns are already head-major within each of q/k/v.
    for h in range(H):
        q_ref[h] = qkv[:, 0 * C + h * D: 0 * C + (h + 1) * D]
        k_ref[h] = qkv[:, 1 * C + h * D: 1 * C + (h + 1) * D]
        v_ref[h] = qkv[:, 2 * C + h * D: 2 * C + (h + 1) * D]


# ---------------------------------------------------------------------------
# Kernel 2: flash-style causal attention over a flattened triangular
# (query-tile, kv-tile) grid + fused output projection on the diagonal step.
# ---------------------------------------------------------------------------
def _flash_attn_kernel(qi_tab_ref, kv_tab_ref,                 # scalar prefetch
                       q_ref, k_ref, v_ref, wp_ref, bp_ref,    # inputs
                       o_ref,                                  # output
                       m_ref, l_ref, acc_ref,                  # scratch
                       *, n_head, tq, tk):
    t = pl.program_id(1)
    qi = qi_tab_ref[t]
    kv = kv_tab_ref[t]

    @pl.when(kv == 0)
    def _init():
        m_ref[...] = jnp.full(m_ref.shape, -jnp.inf, jnp.float32)
        l_ref[...] = jnp.zeros(l_ref.shape, jnp.float32)
        acc_ref[...] = jnp.zeros(acc_ref.shape, jnp.float32)

    def _online_update(masked):
        q = q_ref[...]                                         # (H, tq, D) pre-scaled
        k = k_ref[...]                                         # (H, tk, D)
        v = v_ref[...]                                         # (H, tk, D)
        # Batched over heads; MXU consumes K natively (no explicit transpose).
        s = jnp.einsum('hqd,hkd->hqk', q, k,
                       preferred_element_type=jnp.float32)     # (H, tq, tk) f32
        if masked:
            # Diagonal tile only (tq == tk, tiles aligned => local mask correct).
            row = lax.broadcasted_iota(jnp.int32, (tq, tk), 0)
            col = lax.broadcasted_iota(jnp.int32, (tq, tk), 1)
            s = jnp.where((row >= col)[None, :, :], s, _MASK_VALUE)

        m_prev = m_ref[...]                                    # (H, tq, 1)
        m_new = jnp.maximum(m_prev, jnp.max(s, axis=-1, keepdims=True))
        alpha = jnp.exp(m_prev - m_new)
        p = jnp.exp(s - m_new)                                 # f32

        l_ref[...] = alpha * l_ref[...] + jnp.sum(p, axis=-1, keepdims=True)
        acc_ref[...] = alpha * acc_ref[...] + jnp.einsum(
            'hqk,hkd->hqd', p.astype(v.dtype), v,
            preferred_element_type=jnp.float32)
        m_ref[...] = m_new

    # Interior tiles: no mask work at all.
    @pl.when(kv < qi)
    def _interior():
        _online_update(masked=False)

    # Diagonal tile: masked update, then finalize (last step of this qi run).
    @pl.when(kv == qi)
    def _diag_and_finalize():
        _online_update(masked=True)
        # Normalize the accumulator, not the probabilities.
        # (approx=True is available but exact keeps bit-level reproducibility;
        #  this runs once per output tile so the cost is negligible.)
        y = acc_ref[...] * pl.reciprocal(l_ref[...], approx=False)  # (H, tq, D)
        y = y.astype(wp_ref.dtype)
        # Merge heads into a lane-dense (tq, C) value, single full-depth matmul.
        y2 = jnp.concatenate([y[h] for h in range(n_head)], axis=-1)   # (tq, C)
        out = jnp.dot(y2, wp_ref[...], preferred_element_type=jnp.float32)
        out = out + bp_ref[...]
        o_ref[...] = out.astype(o_ref.dtype)


# ---------------------------------------------------------------------------
# Wrapper
# ---------------------------------------------------------------------------
def causal_self_attention(x, w_attn, b_attn, w_proj, b_proj, n_head,
                          *, seq_tile=256):
    """y = c_proj(causal_attention(c_attn(x)));  W in (in, out) convention."""
    B, T, C = x.shape
    assert C % n_head == 0
    H = n_head
    D = C // H
    dtype = x.dtype
    scale = 1.0 / math.sqrt(D)

    # --- trace-time parameter plumbing (scale folded in f32 BEFORE the cast) ---
    w_attn32 = w_attn.astype(jnp.float32)
    w_qkv = jnp.concatenate([w_attn32[:, :C] * scale, w_attn32[:, C:]],
                            axis=1).astype(dtype)              # (C, 3C)
    b_attn32 = b_attn.reshape(-1).astype(jnp.float32)
    b_qkv = jnp.concatenate([b_attn32[:C] * scale,
                             b_attn32[C:]]).reshape(1, 3 * C)  # (1, 3C) f32
    wp = w_proj.astype(dtype)                                  # (C, C) natural layout
    bp = b_proj.reshape(1, C).astype(jnp.float32)

    # --- tile selection + T padding (keeps causal skip & pipeline depth) ---
    if T <= seq_tile:
        t_seq = T
        T_pad = T
    else:
        t_seq = seq_tile
        T_pad = pl.cdiv(T, t_seq) * t_seq
    n_seq = T_pad // t_seq
    x_p = x if T_pad == T else jnp.pad(x, ((0, 0), (0, T_pad - T), (0, 0)))

    vmem = 48 * 1024 * 1024   # safe on v7x (64 MiB physical), plenty for v5e/v6e

    # ---- Kernel 1: QKV projection (weight-resident, one wide matmul/step) ----
    qkv_shape = jax.ShapeDtypeStruct((B, H, T_pad, D), dtype)
    qkv_out_spec = pl.BlockSpec((pl.Squeezed(), H, t_seq, D),
                                lambda b, ti: (b, 0, ti, 0))
    q, k, v = pl.pallas_call(
        functools.partial(_qkv_proj_kernel, n_head=H, head_dim=D),
        out_shape=(qkv_shape, qkv_shape, qkv_shape),
        grid_spec=pltpu.PrefetchScalarGridSpec(
            num_scalar_prefetch=0,
            grid=(B, T_pad // t_seq),
            in_specs=[
                pl.BlockSpec((pl.Squeezed(), t_seq, C),
                             lambda b, ti: (b, ti, 0)),
                # Constant block index: full QKV weight fetched once, stays in VMEM.
                pl.BlockSpec((C, 3 * C), lambda b, ti: (0, 0)),
                pl.BlockSpec((1, 3 * C), lambda b, ti: (0, 0)),
            ],
            out_specs=(qkv_out_spec, qkv_out_spec, qkv_out_spec),
        ),
        compiler_params=pltpu.CompilerParams(
            dimension_semantics=("parallel", "parallel"),
            vmem_limit_bytes=vmem),
    )(x_p, w_qkv, b_qkv)

    # ---- Triangular (qi, kv) enumeration: no dead grid steps ----
    qi_list, kv_list = [], []
    for qi in range(n_seq):
        for kvi in range(qi + 1):
            qi_list.append(qi)
            kv_list.append(kvi)
    n_tri = len(qi_list)
    qi_tab = jnp.asarray(qi_list, dtype=jnp.int32)
    kv_tab = jnp.asarray(kv_list, dtype=jnp.int32)

    # ---- Kernel 2: flash attention + fused output projection ----
    kernel2 = functools.partial(_flash_attn_kernel, n_head=H, tq=t_seq, tk=t_seq)
    out = pl.pallas_call(
        kernel2,
        out_shape=jax.ShapeDtypeStruct((B, T_pad, C), dtype),
        grid_spec=pltpu.PrefetchScalarGridSpec(
            num_scalar_prefetch=2,
            grid=(B, n_tri),
            in_specs=[
                pl.BlockSpec((pl.Squeezed(), H, t_seq, D),
                             lambda b, s, qi_t, kv_t: (b, 0, qi_t[s], 0)),
                pl.BlockSpec((pl.Squeezed(), H, t_seq, D),
                             lambda b, s, qi_t, kv_t: (b, 0, kv_t[s], 0)),
                pl.BlockSpec((pl.Squeezed(), H, t_seq, D),
                             lambda b, s, qi_t, kv_t: (b, 0, kv_t[s], 0)),
                pl.BlockSpec((C, C), lambda b, s, qi_t, kv_t: (0, 0)),
                pl.BlockSpec((1, C), lambda b, s, qi_t, kv_t: (0, 0)),
            ],
            out_specs=pl.BlockSpec((pl.Squeezed(), t_seq, C),
                                   lambda b, s, qi_t, kv_t: (b, qi_t[s], 0)),
            scratch_shapes=[
                pltpu.VMEM((H, t_seq, 1), jnp.float32),   # running max m
                pltpu.VMEM((H, t_seq, 1), jnp.float32),   # running sum l
                pltpu.VMEM((H, t_seq, D), jnp.float32),   # output accumulator
            ],
        ),
        compiler_params=pltpu.CompilerParams(
            dimension_semantics=("parallel", "arbitrary"),
            vmem_limit_bytes=vmem),
    )(qi_tab, kv_tab, q, k, v, wp, bp)

    if T_pad != T:
        out = out[:, :T, :]
    return out


# ---------------------------------------------------------------------------
# Pure-JAX reference mirroring the PyTorch forward
# ---------------------------------------------------------------------------
def reference(x, w_attn, b_attn, w_proj, b_proj, n_head):
    B, T, C = x.shape
    D = C // n_head
    qkv = x @ w_attn + b_attn
    q, k, v = jnp.split(qkv, 3, axis=-1)
    q = q.reshape(B, T, n_head, D).transpose(0, 2, 1, 3)
    k = k.reshape(B, T, n_head, D).transpose(0, 2, 1, 3)
    v = v.reshape(B, T, n_head, D).transpose(0, 2, 1, 3)
    scores = jnp.einsum('bhtd,bhsd->bhts', q, k) / math.sqrt(D)
    mask = jnp.tril(jnp.ones((T, T), dtype=bool))
    scores = jnp.where(mask[None, None], scores, -jnp.inf)
    att = jax.nn.softmax(scores, axis=-1)
    y = jnp.einsum('bhts,bhsd->bhtd', att, v)
    y = y.transpose(0, 2, 1, 3).reshape(B, T, C)
    return y @ w_proj + b_proj


if __name__ == "__main__":
    # Small config consistent with the module: n_embd divisible by n_head.
    B, T, C, n_head = 2, 16, 32, 4

    key = jax.random.PRNGKey(0)
    k1, k2, k3, k4, k5 = jax.random.split(key, 5)

    x = jax.random.normal(k1, (B, T, C), dtype=jnp.float32)
    w_attn = jax.random.normal(k2, (C, 3 * C), dtype=jnp.float32) * 0.02
    b_attn = jax.random.normal(k4, (3 * C,), dtype=jnp.float32) * 0.01
    w_proj = jax.random.normal(k3, (C, C), dtype=jnp.float32) * 0.02
    b_proj = jax.random.normal(k5, (C,), dtype=jnp.float32) * 0.01

    ref = reference(x, w_attn, b_attn, w_proj, b_proj, n_head)

    # Default tiling (single tile covers T): diagonal path only.
    out = causal_self_attention(x, w_attn, b_attn, w_proj, b_proj, n_head)
    out = jax.block_until_ready(out)
    assert out.shape == (B, T, C)
    assert jnp.allclose(out, ref, atol=1e-4, rtol=1e-4), "mismatch (default tile)"

    # Small tiles: exercises the triangular grid (interior + diagonal tiles,
    # online-softmax carry across kv steps, per-tile finalize).
    out2 = causal_self_attention(x, w_attn, b_attn, w_proj, b_proj, n_head,
                                 seq_tile=8)
    out2 = jax.block_until_ready(out2)
    assert jnp.allclose(out2, ref, atol=1e-4, rtol=1e-4), "mismatch (tiled)"

    print("KERNEL_OK")
</pallas_src>

<mosaic_0001>
module attributes {stable_mosaic.version = 11 : i64} {
  func.func @_qkv_proj_kernel(%arg0: i32, %arg1: i32, %arg2: memref<1x16x32xf32, #tpu.memory_space<vmem>>, %arg3: memref<32x96xf32, #tpu.memory_space<vmem>>, %arg4: memref<1x96xf32, #tpu.memory_space<vmem>>, %arg5: memref<1x4x16x8xf32, #tpu.memory_space<vmem>>, %arg6: memref<1x4x16x8xf32, #tpu.memory_space<vmem>>, %arg7: memref<1x4x16x8xf32, #tpu.memory_space<vmem>>) attributes {dimension_semantics = [#tpu.dimension_semantics<parallel>, #tpu.dimension_semantics<parallel>], iteration_bounds = array<i64: 2, 1>, scalar_prefetch = 0 : i64, scratch_operands = 0 : i64, tpu.core_type = #tpu.core_type<tc>, window_params = [{transform_indices = @transform_0, window_bounds = array<i64: 1, 16, 32>}, {pipeline_mode = #tpu.pipeline_mode<synchronous>, transform_indices = @transform_1, window_bounds = array<i64: 32, 96>}, {pipeline_mode = #tpu.pipeline_mode<synchronous>, transform_indices = @transform_2, window_bounds = array<i64: 1, 96>}, {transform_indices = @transform_3, window_bounds = array<i64: 1, 4, 16, 8>}, {transform_indices = @transform_4, window_bounds = array<i64: 1, 4, 16, 8>}, {transform_indices = @transform_5, window_bounds = array<i64: 1, 4, 16, 8>}]} {
    %c0 = arith.constant 0 : index
    %c0_0 = arith.constant 0 : index
    %c0_1 = arith.constant 0 : index
    %0 = vector.load %arg2[%c0, %c0_0, %c0_1] : memref<1x16x32xf32, #tpu.memory_space<vmem>>, vector<1x16x32xf32>
    %1 = vector.shape_cast %0 : vector<1x16x32xf32> to vector<16x32xf32>
    %c0_2 = arith.constant 0 : index
    %c0_3 = arith.constant 0 : index
    %2 = vector.load %arg3[%c0_2, %c0_3] : memref<32x96xf32, #tpu.memory_space<vmem>>, vector<32x96xf32>
    %cst = arith.constant dense<0.000000e+00> : vector<16x96xf32>
    %3 = tpu.matmul %1, %2, %cst {dimension_numbers = #tpu.dot_dimension_numbers<[1], [0], [0], [1], [0, 0, 1, 1], [], []>} : vector<16x32xf32>, vector<32x96xf32>, vector<16x96xf32> -> vector<16x96xf32>
    %c0_4 = arith.constant 0 : index
    %c0_5 = arith.constant 0 : index
    %4 = vector.load %arg4[%c0_4, %c0_5] : memref<1x96xf32, #tpu.memory_space<vmem>>, vector<1x96xf32>
    %5 = vector.broadcast %4 : vector<1x96xf32> to vector<16x96xf32>
    %6 = arith.addf %3, %5 : vector<16x96xf32>
    %7 = vector.extract_strided_slice %6 {offsets = [0, 0], sizes = [16, 8], strides = [1, 1]} : vector<16x96xf32> to vector<16x8xf32>
    %c0_6 = arith.constant 0 : index
    %c0_7 = arith.constant 0 : index
    %c0_8 = arith.constant 0 : index
    %c0_9 = arith.constant 0 : index
    %8 = vector.load %arg5[%c0_6, %c0_7, %c0_8, %c0_9] : memref<1x4x16x8xf32, #tpu.memory_space<vmem>>, vector<1x1x16x8xf32>
    %9 = vector.shape_cast %8 : vector<1x1x16x8xf32> to vector<16x8xf32>
    %10 = vector.shape_cast %7 : vector<16x8xf32> to vector<1x1x16x8xf32>
    tpu.vector_store %arg5[%c0_6, %c0_7, %c0_8, %c0_9], %10 {strides = array<i32>} : memref<1x4x16x8xf32, #tpu.memory_space<vmem>>, vector<1x1x16x8xf32>,
    %11 = vector.extract_strided_slice %6 {offsets = [0, 32], sizes = [16, 8], strides = [1, 1]} : vector<16x96xf32> to vector<16x8xf32>
    %c0_10 = arith.constant 0 : index
    %c0_11 = arith.constant 0 : index
    %c0_12 = arith.constant 0 : index
    %c0_13 = arith.constant 0 : index
    %12 = vector.load %arg6[%c0_10, %c0_11, %c0_12, %c0_13] : memref<1x4x16x8xf32, #tpu.memory_space<vmem>>, vector<1x1x16x8xf32>
    %13 = vector.shape_cast %12 : vector<1x1x16x8xf32> to vector<16x8xf32>
    %14 = vector.shape_cast %11 : vector<16x8xf32> to vector<1x1x16x8xf32>
    tpu.vector_store %arg6[%c0_10, %c0_11, %c0_12, %c0_13], %14 {strides = array<i32>} : memref<1x4x16x8xf32, #tpu.memory_space<vmem>>, vector<1x1x16x8xf32>,
    %15 = vector.extract_strided_slice %6 {offsets = [0, 64], sizes = [16, 8], strides = [1, 1]} : vector<16x96xf32> to vector<16x8xf32>
    %c0_14 = arith.constant 0 : index
    %c0_15 = arith.constant 0 : index
    %c0_16 = arith.constant 0 : index
    %c0_17 = arith.constant 0 : index
    %16 = vector.load %arg7[%c0_14, %c0_15, %c0_16, %c0_17] : memref<1x4x16x8xf32, #tpu.memory_space<vmem>>, vector<1x1x16x8xf32>
    %17 = vector.shape_cast %16 : vector<1x1x16x8xf32> to vector<16x8xf32>
    %18 = vector.shape_cast %15 : vector<16x8xf32> to vector<1x1x16x8xf32>
    tpu.vector_store %arg7[%c0_14, %c0_15, %c0_16, %c0_17], %18 {strides = array<i32>} : memref<1x4x16x8xf32, #tpu.memory_space<vmem>>, vector<1x1x16x8xf32>,
    %19 = vector.extract_strided_slice %6 {offsets = [0, 8], sizes = [16, 8], strides = [1, 1]} : vector<16x96xf32> to vector<16x8xf32>
    %c0_18 = arith.constant 0 : index
    %c1 = arith.constant 1 : index
    %c0_19 = arith.constant 0 : index
    %c0_20 = arith.constant 0 : index
    %20 = vector.load %arg5[%c0_18, %c1, %c0_19, %c0_20] : memref<1x4x16x8xf32, #tpu.memory_space<vmem>>, vector<1x1x16x8xf32>
    %21 = vector.shape_cast %20 : vector<1x1x16x8xf32> to vector<16x8xf32>
    %22 = vector.shape_cast %19 : vector<16x8xf32> to vector<1x1x16x8xf32>
    tpu.vector_store %arg5[%c0_18, %c1, %c0_19, %c0_20], %22 {strides = array<i32>} : memref<1x4x16x8xf32, #tpu.memory_space<vmem>>, vector<1x1x16x8xf32>,
    %23 = vector.extract_strided_slice %6 {offsets = [0, 40], sizes = [16, 8], strides = [1, 1]} : vector<16x96xf32> to vector<16x8xf32>
    %c0_21 = arith.constant 0 : index
    %c1_22 = arith.constant 1 : index
    %c0_23 = arith.constant 0 : index
    %c0_24 = arith.constant 0 : index
    %24 = vector.load %arg6[%c0_21, %c1_22, %c0_23, %c0_24] : memref<1x4x16x8xf32, #tpu.memory_space<vmem>>, vector<1x1x16x8xf32>
    %25 = vector.shape_cast %24 : vector<1x1x16x8xf32> to vector<16x8xf32>
    %26 = vector.shape_cast %23 : vector<16x8xf32> to vector<1x1x16x8xf32>
    tpu.vector_store %arg6[%c0_21, %c1_22, %c0_23, %c0_24], %26 {strides = array<i32>} : memref<1x4x16x8xf32, #tpu.memory_space<vmem>>, vector<1x1x16x8xf32>,
    %27 = vector.extract_strided_slice %6 {offsets = [0, 72], sizes = [16, 8], strides = [1, 1]} : vector<16x96xf32> to vector<16x8xf32>
    %c0_25 = arith.constant 0 : index
    %c1_26 = arith.constant 1 : index
    %c0_27 = arith.constant 0 : index
    %c0_28 = arith.constant 0 : index
    %28 = vector.load %arg7[%c0_25, %c1_26, %c0_27, %c0_28] : memref<1x4x16x8xf32, #tpu.memory_space<vmem>>, vector<1x1x16x8xf32>
    %29 = vector.shape_cast %28 : vector<1x1x16x8xf32> to vector<16x8xf32>
    %30 = vector.shape_cast %27 : vector<16x8xf32> to vector<1x1x16x8xf32>
    tpu.vector_store %arg7[%c0_25, %c1_26, %c0_27, %c0_28], %30 {strides = array<i32>} : memref<1x4x16x8xf32, #tpu.memory_space<vmem>>, vector<1x1x16x8xf32>,
    %31 = vector.extract_strided_slice %6 {offsets = [0, 16], sizes = [16, 8], strides = [1, 1]} : vector<16x96xf32> to vector<16x8xf32>
    %c0_29 = arith.constant 0 : index
    %c2 = arith.constant 2 : index
    %c0_30 = arith.constant 0 : index
    %c0_31 = arith.constant 0 : index
    %32 = vector.load %arg5[%c0_29, %c2, %c0_30, %c0_31] : memref<1x4x16x8xf32, #tpu.memory_space<vmem>>, vector<1x1x16x8xf32>
    %33 = vector.shape_cast %32 : vector<1x1x16x8xf32> to vector<16x8xf32>
    %34 = vector.shape_cast %31 : vector<16x8xf32> to vector<1x1x16x8xf32>
    tpu.vector_store %arg5[%c0_29, %c2, %c0_30, %c0_31], %34 {strides = array<i32>} : memref<1x4x16x8xf32, #tpu.memory_space<vmem>>, vector<1x1x16x8xf32>,
    %35 = vector.extract_strided_slice %6 {offsets = [0, 48], sizes = [16, 8], strides = [1, 1]} : vector<16x96xf32> to vector<16x8xf32>
    %c0_32 = arith.constant 0 : index
    %c2_33 = arith.constant 2 : index
    %c0_34 = arith.constant 0 : index
    %c0_35 = arith.constant 0 : index
    %36 = vector.load %arg6[%c0_32, %c2_33, %c0_34, %c0_35] : memref<1x4x16x8xf32, #tpu.memory_space<vmem>>, vector<1x1x16x8xf32>
    %37 = vector.shape_cast %36 : vector<1x1x16x8xf32> to vector<16x8xf32>
    %38 = vector.shape_cast %35 : vector<16x8xf32> to vector<1x1x16x8xf32>
    tpu.vector_store %arg6[%c0_32, %c2_33, %c0_34, %c0_35], %38 {strides = array<i32>} : memref<1x4x16x8xf32, #tpu.memory_space<vmem>>, vector<1x1x16x8xf32>,
    %39 = vector.extract_strided_slice %6 {offsets = [0, 80], sizes = [16, 8], strides = [1, 1]} : vector<16x96xf32> to vector<16x8xf32>
    %c0_36 = arith.constant 0 : index
    %c2_37 = arith.constant 2 : index
    %c0_38 = arith.constant 0 : index
    %c0_39 = arith.constant 0 : index
    %40 = vector.load %arg7[%c0_36, %c2_37, %c0_38, %c0_39] : memref<1x4x16x8xf32, #tpu.memory_space<vmem>>, vector<1x1x16x8xf32>
    %41 = vector.shape_cast %40 : vector<1x1x16x8xf32> to vector<16x8xf32>
    %42 = vector.shape_cast %39 : vector<16x8xf32> to vector<1x1x16x8xf32>
    tpu.vector_store %arg7[%c0_36, %c2_37, %c0_38, %c0_39], %42 {strides = array<i32>} : memref<1x4x16x8xf32, #tpu.memory_space<vmem>>, vector<1x1x16x8xf32>,
    %43 = vector.extract_strided_slice %6 {offsets = [0, 24], sizes = [16, 8], strides = [1, 1]} : vector<16x96xf32> to vector<16x8xf32>
    %c0_40 = arith.constant 0 : index
    %c3 = arith.constant 3 : index
    %c0_41 = arith.constant 0 : index
    %c0_42 = arith.constant 0 : index
    %44 = vector.load %arg5[%c0_40, %c3, %c0_41, %c0_42] : memref<1x4x16x8xf32, #tpu.memory_space<vmem>>, vector<1x1x16x8xf32>
    %45 = vector.shape_cast %44 : vector<1x1x16x8xf32> to vector<16x8xf32>
    %46 = vector.shape_cast %43 : vector<16x8xf32> to vector<1x1x16x8xf32>
    tpu.vector_store %arg5[%c0_40, %c3, %c0_41, %c0_42], %46 {strides = array<i32>} : memref<1x4x16x8xf32, #tpu.memory_space<vmem>>, vector<1x1x16x8xf32>,
    %47 = vector.extract_strided_slice %6 {offsets = [0, 56], sizes = [16, 8], strides = [1, 1]} : vector<16x96xf32> to vector<16x8xf32>
    %c0_43 = arith.constant 0 : index
    %c3_44 = arith.constant 3 : index
    %c0_45 = arith.constant 0 : index
    %c0_46 = arith.constant 0 : index
    %48 = vector.load %arg6[%c0_43, %c3_44, %c0_45, %c0_46] : memref<1x4x16x8xf32, #tpu.memory_space<vmem>>, vector<1x1x16x8xf32>
    %49 = vector.shape_cast %48 : vector<1x1x16x8xf32> to vector<16x8xf32>
    %50 = vector.shape_cast %47 : vector<16x8xf32> to vector<1x1x16x8xf32>
    tpu.vector_store %arg6[%c0_43, %c3_44, %c0_45, %c0_46], %50 {strides = array<i32>} : memref<1x4x16x8xf32, #tpu.memory_space<vmem>>, vector<1x1x16x8xf32>,
    %51 = vector.extract_strided_slice %6 {offsets = [0, 88], sizes = [16, 8], strides = [1, 1]} : vector<16x96xf32> to vector<16x8xf32>
    %c0_47 = arith.constant 0 : index
    %c3_48 = arith.constant 3 : index
    %c0_49 = arith.constant 0 : index
    %c0_50 = arith.constant 0 : index
    %52 = vector.load %arg7[%c0_47, %c3_48, %c0_49, %c0_50] : memref<1x4x16x8xf32, #tpu.memory_space<vmem>>, vector<1x1x16x8xf32>
    %53 = vector.shape_cast %52 : vector<1x1x16x8xf32> to vector<16x8xf32>
    %54 = vector.shape_cast %51 : vector<16x8xf32> to vector<1x1x16x8xf32>
    tpu.vector_store %arg7[%c0_47, %c3_48, %c0_49, %c0_50], %54 {strides = array<i32>} : memref<1x4x16x8xf32, #tpu.memory_space<vmem>>, vector<1x1x16x8xf32>,
    return
  }
  func.func @transform_0(%arg0: i32, %arg1: i32) -> (i32, i32, i32) {
    %c0_i32 = arith.constant 0 : i32
    %c0_i32_0 = arith.constant 0 : i32
    return %arg0, %arg1, %c0_i32 : i32, i32, i32
  }
  func.func @transform_1(%arg0: i32, %arg1: i32) -> (i32, i32) {
    %c0_i32 = arith.constant 0 : i32
    %c0_i32_0 = arith.constant 0 : i32
    %c0_i32_1 = arith.constant 0 : i32
    return %c0_i32, %c0_i32_0 : i32, i32
  }
  func.func @transform_2(%arg0: i32, %arg1: i32) -> (i32, i32) {
    %c0_i32 = arith.constant 0 : i32
    %c0_i32_0 = arith.constant 0 : i32
    %c0_i32_1 = arith.constant 0 : i32
    return %c0_i32, %c0_i32_0 : i32, i32
  }
  func.func @transform_3(%arg0: i32, %arg1: i32) -> (i32, i32, i32, i32) {
    %c0_i32 = arith.constant 0 : i32
    %c0_i32_0 = arith.constant 0 : i32
    %c0_i32_1 = arith.constant 0 : i32
    return %arg0, %c0_i32, %arg1, %c0_i32_0 : i32, i32, i32, i32
  }
  func.func @transform_4(%arg0: i32, %arg1: i32) -> (i32, i32, i32, i32) {
    %c0_i32 = arith.constant 0 : i32
    %c0_i32_0 = arith.constant 0 : i32
    %c0_i32_1 = arith.constant 0 : i32
    return %arg0, %c0_i32, %arg1, %c0_i32_0 : i32, i32, i32, i32
  }
  func.func @transform_5(%arg0: i32, %arg1: i32) -> (i32, i32, i32, i32) {
    %c0_i32 = arith.constant 0 : i32
    %c0_i32_0 = arith.constant 0 : i32
    %c0_i32_1 = arith.constant 0 : i32
    return %arg0, %c0_i32, %arg1, %c0_i32_0 : i32, i32, i32, i32
  }
}

</mosaic_0001>

<bundles_post_ra>
// kernel: tpu_custom_call.1
= control target key start
LH: loop header
LB: loop body
LE: loop exit
PB: predicated region body
PF: predicated region fallthrough
CT: control target
= control target key end

     0   :  { %11 = vsyncpa [#allocation3], 0  ;;  %s1278_s0 = inlined_call_operand.hbm [shape: f32[2,16,32], index: 0, kind: input, shape index: {}]   ;;  %s1279_s1 = inlined_call_operand.hbm [shape: f32[32,96], index: 1, kind: input, shape index: {}]   ;;  %s1280_s2 = inlined_call_operand.vmem [shape: f32[1,96], index: 2, kind: input, shape index: {}]   ;;  %s1281_s3 = inlined_call_operand.vmem [shape: f32[2,4,16,8], index: 3, kind: output, shape index: {0}]   ;;  %s1282_s4 = inlined_call_operand.vmem [shape: f32[2,4,16,8], index: 4, kind: output, shape index: {1}]   ;;  %s1283_s5 = inlined_call_operand.vmem [shape: f32[2,4,16,8], index: 5, kind: output, shape index: {2}]  }
   0x1   :  { %13 = vsyncpa [#allocation3 + $0x1], 0 }
   0x2   :  { %14 = vsyncpa [#allocation5], 0  ;;  %s1044_s18 = smov 0   ;;  %s1046_s19 = smov 0  }
   0x3   :  { %s1048_s20 = smov 0   ;;  %s1050_s21 = smov 0  }
   0x4   :  { %s1052_s22 = smov 0   ;;  %s1054_s23 = smov 0  }
   0x5 LB: > { %s737_s24 = sadd.s32 4294967295, %s997_s23   ;;  %p54_p0 = scmp.ne.s32.totalorder %s981_s19, %s977_s18  ;;  %s997_s23 = sphi %s1054_s23, %s20_s23   ;;  %s993_s22 = sphi %s1052_s22, %s1300_s22   ;;  %s989_s21 = sphi %s1050_s21, %s1299_s21   ;;  %s985_s20 = sphi %s1048_s20, %s1298_s20   ;;  %s981_s19 = sphi %s1046_s19, %s1297_s19   ;;  %s977_s18 = sphi %s1044_s18, %s1296_s18  }
   0x6   : > { %p1074_p1 = scmp.eq.s32.totalorder %s737_s24, 0  ;;  %p739_p2 = scmp.ge.s32.totalorder %s997_s23, 1 }
   0x7   : > { %p191_p3 = scmp.lt.s32.totalorder %s997_s23, 3  ;;  %s999_s28 = smov [#allocation4]  }
   0x8   : > { %s1288_s25 = scalar_select %p1074_p1, 1, 0 }
   0x9   : > { %p1082_p4 = por %p1074_p1, %p54_p0  ;;  %p1086_p5 = pnand %p739_p2, %p191_p3 }
   0xa   : > { %s203_s29 = sshll.u32 %s999_s28, 4  ;;  %s32_s6 = sadd.s32 1, %s993_s22  ;;  %s204_s29 = int_to_ptr.vmem [resolvable:$true] %s203_s29 }
   0xb   : > { %s1289_s26 = scalar_select %p1082_p4, 1, 0 }
   0xc   : > { %s1290_s27 = scalar_select %p1086_p5, 1, 0 }
   0xd   : > { %p812_p6 = pneg %p1086_p5  ;;  %s885_s9 = scalar_lea.hbm %s1279_s1, 512 }
   0xe   : > { %p886_p8 = scmp.ne.s32.totalorder %s1279_s1, %s885_s9  ;;  %p892_p12 = scmp.lt.u32.totalorder %s885_s9, %s1279_s1 }
   0xf   : > { %p1094_p7 = pnand %p812_p6, %p1074_p1 }
  0x11   : > { %p887_p9 = pneg %p1094_p7 }
  0x13   : > { %p888_p10 = pnand %p887_p9, %p886_p8 }
  0x15   : > { %p889_p11 = pneg %p888_p10 }
  0x17   : > { %p894_p13 = pnand %p892_p12, %p889_p11 }
  0x19   : > { %897 = shalt.err (!%p894_p13)
}
  0x1a   : > { %s898_s14 = scalar_lea.vmem %s204_s29, 512  ;;  %p906_p6 = scmp.lt.s32.totalorder %s204_s29, %s204_s29 }
  0x1b   : > { %p899_p0 = scmp.ne.s32.totalorder %s204_s29, %s898_s14  ;;  %p907_p1 = scmp.lt.s32.totalorder %s898_s14, %s898_s14 }
  0x1d   : > { %p901_p2 = pnand %p899_p0, %p887_p9  ;;  %p908_p4 = por %p907_p1, %p906_p6 }
  0x1f   : > { %p902_p3 = pneg %p901_p2 }
  0x21   : > { %p909_p5 = pnand %p908_p4, %p902_p3 }
  0x23   : > { %912 = shalt.err (!%p909_p5)
}
  0x24   : > { %s1000_s15 = smov 128   ;;  %s1001_s16 = smov 8  }
  0x25   : > { %815 = dma.hbm_to_vmem [thread:$0]  (!%p1094_p7), %s1279_s1, 512, %s204_s29, [#allocation5], %s1000_s15, %s1000_s15, %s1001_s16  }
  0x26   : > { %p34_p1 = scmp.ge.s32.totalorder %s32_s6, 2  ;;  %s41_s24 = sadd.s32 1, %s985_s20 }
  0x27   : > { %p48_p4 = scmp.ne.s32.totalorder %s985_s20, %s981_s19  ;;  %p49_p5 = scmp.eq.s32.totalorder %s997_s23, 0 }
  0x28   : > { %s1302_s6 = smov (%p34_p1, %s32_s6), 0  ;;  %p821_p9 = scmp.lt.s32.totalorder %s997_s23, 2 }
  0x29   : > { %p50_p8 = por %p49_p5, %p48_p4  ;;  %s36_s28 = ssub.s32 %s993_s22, %s1302_s6 }
  0x2a   : > { %s220_s7 = sand.u32 1, %s985_s20   ;;  %p39_p10 = scmp.eq.s32.totalorder %s36_s28, 0 }
  0x2b   : > { %s742_s30 = sshll.u32 %s220_s7, 4  ;;  %s777_s8 = sshll.u32 %s993_s22, 8 }
  0x2c   : > { %s1130_s9 = scalar_select %p39_p10, %s985_s20, %s41_s24  }
  0x2d   : > { %s1135_s29 = scalar_lea.hbm %s1278_s0, %s777_s8  ;;  %s224_s12 = scalar_lea.vmem [#allocation2], %s742_s30 }
  0x2e   : > { %s233_s13 = sshll.u32 %s224_s12, 4  ;;  %p1137_p7 = pnand %p821_p9, %p50_p8  ;;  %s1141_s13 = int_to_ptr.vmem [resolvable:$true] %s233_s13 }
  0x2f   : > { %s1143_s17 = scalar_lea.sflag [#allocation3], %s220_s7  ;;  %s913_s18 = scalar_lea.hbm %s1135_s29, 256 }
  0x30   : > { %p914_p11 = scmp.ne.s32.totalorder %s1135_s29, %s913_s18  ;;  %p915_p12 = pneg %p1137_p7 }
  0x31   : > { %s918_s30 = scalar_lea.hbm %s1278_s0, 512  ;;  %p919_p2 = scmp.lt.u32.totalorder %s1135_s29, %s1278_s0 }
  0x32   : > { %p916_p13 = pnand %p915_p12, %p914_p11  ;;  %p920_p3 = scmp.lt.u32.totalorder %s918_s30, %s913_s18 }
  0x33   : > { %p922_p1 = scmp.lt.u32.totalorder %s913_s18, %s1135_s29 }
  0x34   : > { %p917_p0 = pneg %p916_p13  ;;  %p921_p6 = por %p920_p3, %p919_p2 }
  0x36   : > { %p923_p4 = por %p922_p1, %p921_p6 }
  0x38   : > { %p924_p5 = pnand %p923_p4, %p917_p0 }
  0x3a   : > { %927 = shalt.err (!%p924_p5)
}
  0x3b   : > { %s928_s7 = scalar_lea.vmem %s1141_s13, 256  ;;  %s1002_s11 = smov [#allocation2]  }
  0x3c   : > { %p929_p8 = scmp.ne.s32.totalorder %s1141_s13, %s928_s7  ;;  %s933_s12 = sshll.u32 %s1002_s11, 4  ;;  %s934_s12 = int_to_ptr.vmem [resolvable:$false] %s933_s12 }
  0x3d   : > { %s935_s24 = scalar_lea.vmem %s934_s12, 512  ;;  %p936_p11 = scmp.lt.s32.totalorder %s1141_s13, %s934_s12 }
  0x3e   : > { %p931_p9 = pnand %p929_p8, %p915_p12  ;;  %p937_p13 = scmp.lt.s32.totalorder %s935_s24, %s928_s7 }
  0x40   : > { %p932_p10 = pneg %p931_p9  ;;  %p938_p2 = por %p937_p13, %p936_p11 }
  0x42   : > { %p939_p3 = pnand %p938_p2, %p932_p10 }
  0x44   : > { %942 = shalt.err (!%p939_p3)
}
  0x45   : > { %819 = dma.hbm_to_vmem [thread:$0]  (!%p1137_p7), %s1135_s29, 256, %s1141_s13, %s1143_s17, %s1000_s15, %s1000_s15, %s1001_s16  }
  0x46   : > { %p1293_p12 = scmp.ne.s32.totalorder %s1290_s27, 0 }
  0x47   : > { %s247_s18 = sand.u32 (!%p1293_p12), 1, %s981_s19   ;;  %p1294_p0 = scmp.ne.s32.totalorder (!%p1293_p12), %s1289_s26, 0 }
  0x48   : > { %245 = sbr.rel (%p1293_p12) target bundleno = 464 (0x1d0), region = 32  ;;  %s746_s28 = sshll.u32 (!%p1293_p12), %s247_s18, 4 }
  0x49   : > { %s248_s30 = scalar_lea.sflag (!%p1293_p12), [#allocation3], %s247_s18  ;;  %s251_s8 = scalar_lea.vmem (!%p1293_p12), [#allocation2], %s746_s28 }
  0x4f   : > { %968 = dma.done.wait (%p1294_p0), %s248_s30, 256  }
  0x50   : > { %970 = vsyncadd (%p1294_p0), %s248_s30, 4294967040  ;;  %p1295_p6 = scmp.ne.s32.totalorder %s1288_s25, 0 }
  0x52   : > { %972 = dma.done.wait (%p1295_p6), [#allocation5], 512  }
  0x53   : > { %974 = vsyncadd (%p1295_p6), [#allocation5], 4294966784  ;;  %vm348_vm0 = vcmask 261120   ;;  %v337_v0 = vld [vmem:[#allocation4] sm:$0xff]  ;;  %v338_v1 = vld [vmem:[#allocation4 + $0x8] sm:$0xff]  ;;  %p306_p7 = scmp.lt.s32.totalorder %s989_s21, 1 }
  0x54   : > { %v339_v2 = vld [vmem:[#allocation4 + $0x10] sm:$0xff]  ;;  %v798_v3 = vpack.c.bf16 %v338_v1, %v337_v0  ;;  %v340_v4 = vld [vmem:[#allocation4 + $0x18] sm:$0xff]  ;;  %v754_v8 = vld [vmem:[%s1280_s2] ss:$0 sm:$0xff]  ;;  %vm430_vm1 = vcmask 64512   ;;  %s1003_s13 = smov 64  }
  0x55   : > { %v335_v5 = vld [vmem:[%s251_s8] sm:$0xff]  ;;  %v802_v6 = vpack.c.bf16 %v340_v4, %v339_v2  ;;  %v336_v7 = vld [vmem:[%s251_s8 + $0x8] sm:$0xff]  ;;  %s1304_s21 = smov (!%p306_p7, %s989_s21), 1  ;;  %s1005_s14 = smov 120  }
  0x56   : > { %795 = vmatprep.mubr.msk.f32.mxu0 %vm348_vm0, %v335_v5  ;;  %799 = vmatprep.subr.bf16.mxu0 %v798_v3  ;;  %s1187_s25 = sshll.u32 %s1304_s21, 6  ;;  %s1004_s21 = smov 96  }
  0x57   : > { %801 = vmatpush3.bf16.msra.mxu0 %v798_v3  ;;  %s1196_s29 = scalar_lea.vmem %s1281_s3, %s1187_s25  ;;  %s1006_s17 = smov 88  }
  0x58   : > { %803 = vmatprep.subr.bf16.mxu0 %v802_v6  ;;  %s1007_s10 = smov 56   ;;  %s1008_s7 = smov 112  }
  0x59   : > { %s1009_s11 = smov 80   ;;  %s1010_s12 = smov 48  }
  0x5a   : > { %s1011_s24 = smov 104   ;;  %s1012_s18 = smov 72  }
  0x5b   : > { %805 = vmatpush3.bf16.msra.mxu0 %v802_v6  ;;  %s1013_s28 = smov 40   ;;  %s1208_s26 = scalar_lea.vmem %s1283_s5, %s1187_s25 }
  0x5c   : > { %s1214_s16 = scalar_lea.vmem %s1282_s4, %s1187_s25 }
  0x5e   : > { %796 = vmatmul.mubr.msk.f32.vlgmr.msra.gmra.mrb[0].mxu0 %vm348_vm0, %v336_v7 }
 0x131   : > { %v797_v9 = vpop.f32.mrb[0].mxu0 }
 0x132   : > { %v427_v10 = vadd.f32 %v797_v9, %v754_v8  ;;  %v421_v11 = vpop.f32.mrb[1].mxu0 }
 0x133   : > { %v422_v12 = vadd.f32 %v754_v8, %v421_v11 }
 0x134   : > { %445 = vrot.lane.b32.xlu1 %v427_v10, %s1003_s13  ;;  %437 = vrot.lane.b32.xlu0 %v427_v10, %s1004_s21  ;;  %432 = vst.msk [vmem:[%s1196_s29 + $0x8] sm:$0xff] %vm430_vm1, %v427_v10 }
 0x135   : > { %431 = vst.msk [vmem:[%s1196_s29] sm:$0xff] %vm430_vm1, %v422_v12 }
 0x138   : > { %453 = vrot.lane.b32.xlu1 %v427_v10, %s1005_s14  ;;  %435 = vrot.lane.b32.xlu0 %v422_v12, %s1004_s21 }
 0x13c   : > { %462 = vrot.lane.b32.xlu1 %v427_v10, %s1006_s17  ;;  %451 = vrot.lane.b32.xlu0 %v422_v12, %s1005_s14 }
 0x140   : > { %471 = vrot.lane.b32.xlu1 %v427_v10, %s1007_s10  ;;  %460 = vrot.lane.b32.xlu0 %v422_v12, %s1006_s17 }
 0x144   : > { %480 = vrot.lane.b32.xlu1 %v427_v10, %s1008_s7  ;;  %469 = vrot.lane.b32.xlu0 %v422_v12, %s1007_s10 }
 0x148   : > { %489 = vrot.lane.b32.xlu1 %v427_v10, %s1009_s11  ;;  %478 = vrot.lane.b32.xlu0 %v422_v12, %s1008_s7 }
 0x14c   : > { %498 = vrot.lane.b32.xlu1 %v427_v10, %s1010_s12  ;;  %487 = vrot.lane.b32.xlu0 %v422_v12, %s1009_s11 }
 0x150   : > { %507 = vrot.lane.b32.xlu1 %v427_v10, %s1011_s24  ;;  %496 = vrot.lane.b32.xlu0 %v422_v12, %s1010_s12 }
 0x154   : > { %516 = vrot.lane.b32.xlu1 %v427_v10, %s1012_s18  ;;  %505 = vrot.lane.b32.xlu0 %v422_v12, %s1011_s24 }
 0x158   : > { %443 = vrot.lane.b32.xlu1 %v422_v12, %s1003_s13  ;;  %514 = vrot.lane.b32.xlu0 %v422_v12, %s1012_s18 }
 0x15c   : > { %525 = vrot.lane.b32.xlu1 %v427_v10, %s1013_s28  ;;  %523 = vrot.lane.b32.xlu0 %v422_v12, %s1013_s28 }
 0x1a6   : > { %v446_v13 = vpop.permute.xlu1 %445  ;;  %v438_v14 = vpop.permute.xlu0 %437 }
 0x1a7   : > { %450 = vst.msk [vmem:[%s1208_s26 + $0x8] sm:$0xff] %vm430_vm1, %v446_v13  ;;  %442 = vst.msk [vmem:[%s1214_s16 + $0x8] sm:$0xff] %vm430_vm1, %v438_v14 }
 0x1aa   : > { %v454_v15 = vpop.permute.xlu1 %453  ;;  %v436_v16 = vpop.permute.xlu0 %435 }
 0x1ab   : > { %758 = vst.msk [vmem:[%s1196_s29 + $0x18] sm:$0xff] %vm430_vm1, %v454_v15  ;;  %441 = vst.msk [vmem:[%s1214_s16] sm:$0xff] %vm430_vm1, %v436_v16 }
 0x1ae   : > { %v463_v17 = vpop.permute.xlu1 %462  ;;  %v452_v18 = vpop.permute.xlu0 %451 }
 0x1af   : > { %760 = vst.msk [vmem:[%s1214_s16 + $0x18] sm:$0xff] %vm430_vm1, %v463_v17  ;;  %757 = vst.msk [vmem:[%s1196_s29 + $0x10] sm:$0xff] %vm430_vm1, %v452_v18 }
 0x1b2   : > { %v472_v19 = vpop.permute.xlu1 %471  ;;  %v461_v20 = vpop.permute.xlu0 %460 }
 0x1b3   : > { %762 = vst.msk [vmem:[%s1208_s26 + $0x18] sm:$0xff] %vm430_vm1, %v472_v19  ;;  %759 = vst.msk [vmem:[%s1214_s16 + $0x10] sm:$0xff] %vm430_vm1, %v461_v20 }
 0x1b6   : > { %v481_v21 = vpop.permute.xlu1 %480  ;;  %v470_v22 = vpop.permute.xlu0 %469 }
 0x1b7   : > { %764 = vst.msk [vmem:[%s1196_s29 + $0x28] sm:$0xff] %vm430_vm1, %v481_v21  ;;  %761 = vst.msk [vmem:[%s1208_s26 + $0x10] sm:$0xff] %vm430_vm1, %v470_v22 }
 0x1ba   : > { %v490_v23 = vpop.permute.xlu1 %489  ;;  %v479_v24 = vpop.permute.xlu0 %478 }
 0x1bb   : > { %766 = vst.msk [vmem:[%s1214_s16 + $0x28] sm:$0xff] %vm430_vm1, %v490_v23  ;;  %763 = vst.msk [vmem:[%s1196_s29 + $0x20] sm:$0xff] %vm430_vm1, %v479_v24 }
 0x1be   : > { %v499_v25 = vpop.permute.xlu1 %498  ;;  %v488_v26 = vpop.permute.xlu0 %487 }
 0x1bf   : > { %768 = vst.msk [vmem:[%s1208_s26 + $0x28] sm:$0xff] %vm430_vm1, %v499_v25  ;;  %765 = vst.msk [vmem:[%s1214_s16 + $0x20] sm:$0xff] %vm430_vm1, %v488_v26 }
 0x1c2   : > { %v508_v27 = vpop.permute.xlu1 %507  ;;  %v497_v28 = vpop.permute.xlu0 %496 }
 0x1c3   : > { %770 = vst.msk [vmem:[%s1196_s29 + $0x38] sm:$0xff] %vm430_vm1, %v508_v27  ;;  %767 = vst.msk [vmem:[%s1208_s26 + $0x20] sm:$0xff] %vm430_vm1, %v497_v28 }
 0x1c6   : > { %v517_v29 = vpop.permute.xlu1 %516  ;;  %v506_v30 = vpop.permute.xlu0 %505 }
 0x1c7   : > { %772 = vst.msk [vmem:[%s1214_s16 + $0x38] sm:$0xff] %vm430_vm1, %v517_v29  ;;  %769 = vst.msk [vmem:[%s1196_s29 + $0x30] sm:$0xff] %vm430_vm1, %v506_v30 }
 0x1ca   : > { %v444_v31 = vpop.permute.xlu1 %443  ;;  %v515_v32 = vpop.permute.xlu0 %514 }
 0x1cb   : > { %449 = vst.msk [vmem:[%s1208_s26] sm:$0xff] %vm430_vm1, %v444_v31  ;;  %771 = vst.msk [vmem:[%s1214_s16 + $0x30] sm:$0xff] %vm430_vm1, %v515_v32 }
 0x1ce   : > { %v526_v33 = vpop.permute.xlu1 %525  ;;  %v524_v34 = vpop.permute.xlu0 %523 }
 0x1cf   : > { %774 = vst.msk [vmem:[%s1208_s26 + $0x38] sm:$0xff] %vm430_vm1, %v526_v33  ;;  %773 = vst.msk [vmem:[%s1208_s26 + $0x30] sm:$0xff] %vm430_vm1, %v524_v34 }
 0x1d0 PF: > { %s20_s23 = sadd.s32 1, %s997_s23   ;;  %s1296_s18 = smov %s981_s19 }
 0x1d1   : > { %p17_p1 = scmp.ge.s32.totalorder %s20_s23, 4   ;;  %s1297_s19 = smov %s985_s20 }
 0x1d2   : > { %s1298_s20 = smov %s1130_s9  ;;  %s1299_s21 = smov %s993_s22 }
 0x1d3   : > { %s1300_s22 = smov %s1302_s6  ;;  %19 = sbr.rel (!%p17_p1) target bundleno = 5 (0x5), region = 109 }
 0x1da   :  { %612 = vsyncpa [#allocation3], 1 }
 0x1db   :  { %614 = vsyncpa [#allocation3 + $0x1], 1 }
 0x1dc   :  { %615 = vsyncpa [#allocation5], 1 }

</bundles_post_ra>
